<compile_context>
chip_gen: v7x
topology: tpu7x:2x2x1
jax: 0.10.0
libtpu: 0.0.40
codegen_flags: <defaults>
</compile_context>

<pallas_src>
import functools

import jax
import jax.numpy as jnp
from jax.experimental import pallas as pl
from jax.experimental.pallas import tpu as pltpu


_LANE = 128  # lane-dense padding for the logits


# ----------------------------- in-kernel PRNG --------------------------------

def _uniform_bits(shape, seed_u32, salt):
    # Counter-based hash PRNG: murmur3-style finalizer over a linear element
    # index mixed with the seed.  Pure integer VPU ops (iota/xor/mul/shift).
    idx = jnp.zeros(shape, jnp.int32)
    stride = 1
    for d in range(len(shape) - 1, -1, -1):
        idx = idx + jax.lax.broadcasted_iota(jnp.int32, shape, d) * stride
        stride *= shape[d]
    x = idx.astype(jnp.uint32) * jnp.uint32(0x9E3779B1)
    x = x ^ (seed_u32 + jnp.uint32((salt * 0x85EBCA77) & 0xFFFFFFFF))
    x = x ^ (x >> 16)
    x = x * jnp.uint32(0x7FEB352D)
    x = x ^ (x >> 15)
    x = x * jnp.uint32(0x846CA68B)
    x = x ^ (x >> 16)
    return x


def _dropout(x, p, seed_u32, salt):
    # Inverted dropout: drop with prob p, scale survivors by 1/(1-p).
    bits = _uniform_bits(x.shape, seed_u32, salt)
    r = (bits >> 1).astype(jnp.int32)              # uniform in [0, 2^31)
    keep = r >= jnp.int32(int(p * (1 << 31)))      # True with prob (1 - p)
    return jnp.where(keep, x * (1.0 / (1.0 - p)), 0.0)


# ----------------------------- fused Pallas kernel ---------------------------

def cnn_fused_kernel(seed_ref, xw_ref, wc_ref, bc_ref, w1_ref, b1_ref,
                     w2_ref, b2_ref, out_ref, *, kw, dropout_p):
    # xw_ref : (W, B, KH)     input, position-major
    # wc_ref : (KW, KH, NK)   conv weight, wc_ref[j, h, n] = conv1.weight[n, 0, h, j]
    # bc_ref : (1, NK)
    # w1_ref : (Wout, NK, H)  fc1 weight with PyTorch flatten order folded in
    # b1_ref : (1, H)
    # w2_ref : (H, CPAD)      fc2 weight, zero-padded to lane-dense CPAD cols
    # b2_ref : (1, CPAD)
    # out_ref: (B, CPAD)
    W, B, KH = xw_ref.shape
    NK = wc_ref.shape[2]
    wout = W - kw + 1

    xw = xw_ref[...]

    # --- conv1 (full-height kernel) + bias + relu, position-major output ----
    conv = jnp.zeros((wout, B, NK), jnp.float32)
    for j in range(kw):                              # static unroll (kw small)
        xs = xw[j:j + wout]                          # (Wout, B, KH) static slice
        wj = jnp.broadcast_to(wc_ref[j], (wout, KH, NK))
        conv = conv + jnp.einsum('tbh,thn->tbn', xs, wj,
                                 preferred_element_type=jnp.float32)
    conv = jnp.maximum(conv + bc_ref[...], 0.0)      # (Wout, B, NK)

    # Seed mix includes the grid index so masks stay distinct if tiled later.
    seed_u32 = (seed_ref[0].astype(jnp.uint32)
                + (pl.program_id(0).astype(jnp.uint32) + jnp.uint32(1))
                * jnp.uint32(0x9E3779B9))

    if dropout_p > 0.0:
        conv = _dropout(conv, dropout_p, seed_u32, salt=1)

    # --- fc1 + relu: contract over (Wout, NK) as batched matmul + reduce ----
    p1 = jnp.einsum('tbn,tnh->tbh', conv, w1_ref[...],
                    preferred_element_type=jnp.float32)       # (Wout, B, H)
    h = jnp.maximum(jnp.sum(p1, axis=0) + b1_ref[...], 0.0)   # (B, H)

    if dropout_p > 0.0:
        h = _dropout(h, dropout_p, seed_u32, salt=2)

    # --- fc2 (lane-dense padded logits) --------------------------------------
    out_ref[...] = (jnp.dot(h, w2_ref[...], preferred_element_type=jnp.float32)
                    + b2_ref[...])


# ----------------------------- pallas_call wrapper ---------------------------

def cnn_pallas_call(seed, xw, wc_s, bc_row, w1r, b1_row, w2p, b2p, dropout_p):
    W, B, KH = xw.shape
    kw, _, NK = wc_s.shape
    wout, _, H = w1r.shape
    CPAD = w2p.shape[1]
    kernel = functools.partial(cnn_fused_kernel, kw=kw,
                               dropout_p=float(dropout_p))
    return pl.pallas_call(
        kernel,
        out_shape=jax.ShapeDtypeStruct((B, CPAD), jnp.float32),
        grid_spec=pltpu.PrefetchScalarGridSpec(
            num_scalar_prefetch=1,          # seed lives in SMEM
            grid=(1,),                      # everything fits in VMEM at once
            in_specs=[
                pl.BlockSpec((W, B, KH), lambda i, s: (0, 0, 0)),
                pl.BlockSpec((kw, KH, NK), lambda i, s: (0, 0, 0)),
                pl.BlockSpec((1, NK), lambda i, s: (0, 0)),
                pl.BlockSpec((wout, NK, H), lambda i, s: (0, 0, 0)),
                pl.BlockSpec((1, H), lambda i, s: (0, 0)),
                pl.BlockSpec((H, CPAD), lambda i, s: (0, 0)),
                pl.BlockSpec((1, CPAD), lambda i, s: (0, 0)),
            ],
            out_specs=pl.BlockSpec((B, CPAD), lambda i, s: (0, 0)),
        ),
    )(seed, xw, wc_s, bc_row, w1r, b1_row, w2p, b2p)


# ----------------------------- forward (thin glue) ---------------------------

def cnn_forward(x, params, dropout_p, seed):
    wc, bc, w1, b1, w2, b2 = params
    nk, _, kh, kw = wc.shape
    W = x.shape[3]
    wout = W - kw + 1
    H = w1.shape[0]
    C = w2.shape[0]

    # One-time input / parameter re-layout (tiny, no runtime gathers).
    xw = jnp.transpose(x[:, 0], (2, 0, 1))                   # (W, B, KH)
    wc_s = jnp.transpose(wc[:, 0], (2, 1, 0))                # (KW, KH, NK)
    bc_row = bc.reshape(1, nk)
    # Fold PyTorch flatten order (feature f = n*Wout + t) into fc1 weights.
    w1r = jnp.transpose(w1.reshape(H, nk, wout), (2, 1, 0))  # (Wout, NK, H)
    b1_row = b1.reshape(1, H)
    # Lane-dense logits: zero-pad fc2 to _LANE output columns.
    w2p = jnp.zeros((H, _LANE), jnp.float32).at[:, :C].set(w2.T)
    b2p = jnp.zeros((1, _LANE), jnp.float32).at[0, :C].set(b2)

    out_pad = cnn_pallas_call(seed, xw, wc_s, bc_row, w1r, b1_row, w2p, b2p,
                              dropout_p)
    return out_pad[:, :C]


def ref_forward_no_dropout(x, params):
    # pure-JAX reference for the dropout_p == 0 case
    wc, bc, w1, b1, w2, b2 = params
    out = jax.lax.conv_general_dilated(
        x, wc, (1, 1), "VALID", dimension_numbers=("NCHW", "OIHW", "NCHW"))
    out = jax.nn.relu(out + bc[None, :, None, None])
    out = out.reshape(out.shape[0], -1)
    out = jax.nn.relu(out @ w1.T + b1)
    return out @ w2.T + b2


# ----------------------------- main -------------------------------------------

if __name__ == "__main__":
    # module hyper-parameters (small, consistent with the forward pass)
    kernel_size = (4, 3)     # (KH, KW)
    seq_len = 16             # W
    n_kernels = 8
    hidden_size = 32
    n_classes = 10
    dropout_p = 0.25
    batch = 2

    kh, kw = kernel_size
    key = jax.random.PRNGKey(0)
    kx, kc, kcb, k1, k1b, k2, k2b = jax.random.split(key, 7)

    # input: NCHW, single channel, height == KH so conv output height == 1
    x = jax.random.normal(kx, (batch, 1, kh, seq_len), dtype=jnp.float32)

    # deterministic parameter init (PyTorch-style uniform bounds)
    def uinit(k, shape, fan_in):
        b = 1.0 / jnp.sqrt(fan_in)
        return jax.random.uniform(k, shape, jnp.float32, -b, b)

    fc1_in = n_kernels * (seq_len - kw + 1)
    wc = uinit(kc, (n_kernels, 1, kh, kw), kh * kw)
    bc = uinit(kcb, (n_kernels,), kh * kw)
    w1 = uinit(k1, (hidden_size, fc1_in), fc1_in)
    b1 = uinit(k1b, (hidden_size,), fc1_in)
    w2 = uinit(k2, (n_classes, hidden_size), hidden_size)
    b2 = uinit(k2b, (n_classes,), hidden_size)
    params = (wc, bc, w1, b1, w2, b2)

    seed = jnp.array([0], dtype=jnp.int32)

    # correctness check against pure-JAX reference with dropout disabled
    out_nodrop = jax.block_until_ready(cnn_forward(x, params, 0.0, seed))
    ref = jax.block_until_ready(ref_forward_no_dropout(x, params))
    assert out_nodrop.shape == (batch, n_classes)
    assert jnp.allclose(out_nodrop, ref, atol=1e-3, rtol=1e-3), "mismatch vs reference"

    # run with dropout active (F.dropout default training=True)
    out = jax.block_until_ready(cnn_forward(x, params, dropout_p, seed))
    assert out.shape == (batch, n_classes)
    assert bool(jnp.all(jnp.isfinite(out)))

    print("KERNEL_OK")
</pallas_src>

<mosaic_0001>
module attributes {stable_mosaic.version = 11 : i64} {
  func.func @cnn_fused_kernel(%arg0: i32, %arg1: memref<1xi32, #tpu.memory_space<smem>>, %arg2: memref<16x2x4xf32, #tpu.memory_space<vmem>>, %arg3: memref<3x4x8xf32, #tpu.memory_space<vmem>>, %arg4: memref<1x8xf32, #tpu.memory_space<vmem>>, %arg5: memref<14x8x32xf32, #tpu.memory_space<vmem>>, %arg6: memref<1x32xf32, #tpu.memory_space<vmem>>, %arg7: memref<32x128xf32, #tpu.memory_space<vmem>>, %arg8: memref<1x128xf32, #tpu.memory_space<vmem>>, %arg9: memref<2x128xf32, #tpu.memory_space<vmem>>) attributes {dimension_semantics = [#tpu.dimension_semantics<arbitrary>], iteration_bounds = array<i64: 1>, scalar_prefetch = 1 : i64, scratch_operands = 0 : i64, tpu.core_type = #tpu.core_type<tc>, window_params = [{pipeline_mode = #tpu.pipeline_mode<synchronous>, transform_indices = @transform_0, window_bounds = array<i64: 16, 2, 4>}, {pipeline_mode = #tpu.pipeline_mode<synchronous>, transform_indices = @transform_1, window_bounds = array<i64: 3, 4, 8>}, {pipeline_mode = #tpu.pipeline_mode<synchronous>, transform_indices = @transform_2, window_bounds = array<i64: 1, 8>}, {pipeline_mode = #tpu.pipeline_mode<synchronous>, transform_indices = @transform_3, window_bounds = array<i64: 14, 8, 32>}, {pipeline_mode = #tpu.pipeline_mode<synchronous>, transform_indices = @transform_4, window_bounds = array<i64: 1, 32>}, {pipeline_mode = #tpu.pipeline_mode<synchronous>, transform_indices = @transform_5, window_bounds = array<i64: 32, 128>}, {pipeline_mode = #tpu.pipeline_mode<synchronous>, transform_indices = @transform_6, window_bounds = array<i64: 1, 128>}, {pipeline_mode = #tpu.pipeline_mode<synchronous>, transform_indices = @transform_7, window_bounds = array<i64: 2, 128>}]} {
    %c0 = arith.constant 0 : index
    %c0_0 = arith.constant 0 : index
    %c0_1 = arith.constant 0 : index
    %0 = vector.load %arg2[%c0, %c0_0, %c0_1] : memref<16x2x4xf32, #tpu.memory_space<vmem>>, vector<16x2x4xf32>
    %cst = arith.constant 0.000000e+00 : f32
    %1 = vector.broadcast %cst : f32 to vector<14x2x8xf32>
    %2 = vector.extract_strided_slice %0 {offsets = [0, 0, 0], sizes = [14, 2, 4], strides = [1, 1, 1]} : vector<16x2x4xf32> to vector<14x2x4xf32>
    %c0_2 = arith.constant 0 : index
    %c0_3 = arith.constant 0 : index
    %c0_4 = arith.constant 0 : index
    %3 = vector.load %arg3[%c0_2, %c0_3, %c0_4] : memref<3x4x8xf32, #tpu.memory_space<vmem>>, vector<1x4x8xf32>
    %4 = vector.shape_cast %3 : vector<1x4x8xf32> to vector<4x8xf32>
    %5 = vector.shape_cast %4 : vector<4x8xf32> to vector<1x4x8xf32>
    %6 = vector.broadcast %5 : vector<1x4x8xf32> to vector<14x4x8xf32>
    "tpu.trace_start"() <{level = 10 : i32, message = "tbh,thn->tbn"}> : () -> ()
    %cst_5 = arith.constant dense<0.000000e+00> : vector<14x2x8xf32>
    %7 = tpu.matmul %2, %6, %cst_5 {dimension_numbers = #tpu.dot_dimension_numbers<[2], [1], [1], [2], [0, 0, 0, 1, 1, 2], [0], [0]>} : vector<14x2x4xf32>, vector<14x4x8xf32>, vector<14x2x8xf32> -> vector<14x2x8xf32>
    "tpu.trace_stop"() : () -> ()
    %8 = arith.addf %1, %7 : vector<14x2x8xf32>
    %9 = vector.extract_strided_slice %0 {offsets = [1, 0, 0], sizes = [14, 2, 4], strides = [1, 1, 1]} : vector<16x2x4xf32> to vector<14x2x4xf32>
    %c1 = arith.constant 1 : index
    %c0_6 = arith.constant 0 : index
    %c0_7 = arith.constant 0 : index
    %10 = vector.load %arg3[%c1, %c0_6, %c0_7] : memref<3x4x8xf32, #tpu.memory_space<vmem>>, vector<1x4x8xf32>
    %11 = vector.shape_cast %10 : vector<1x4x8xf32> to vector<4x8xf32>
    %12 = vector.shape_cast %11 : vector<4x8xf32> to vector<1x4x8xf32>
    %13 = vector.broadcast %12 : vector<1x4x8xf32> to vector<14x4x8xf32>
    "tpu.trace_start"() <{level = 10 : i32, message = "tbh,thn->tbn"}> : () -> ()
    %cst_8 = arith.constant dense<0.000000e+00> : vector<14x2x8xf32>
    %14 = tpu.matmul %9, %13, %cst_8 {dimension_numbers = #tpu.dot_dimension_numbers<[2], [1], [1], [2], [0, 0, 0, 1, 1, 2], [0], [0]>} : vector<14x2x4xf32>, vector<14x4x8xf32>, vector<14x2x8xf32> -> vector<14x2x8xf32>
    "tpu.trace_stop"() : () -> ()
    %15 = arith.addf %8, %14 : vector<14x2x8xf32>
    %16 = vector.extract_strided_slice %0 {offsets = [2, 0, 0], sizes = [14, 2, 4], strides = [1, 1, 1]} : vector<16x2x4xf32> to vector<14x2x4xf32>
    %c2 = arith.constant 2 : index
    %c0_9 = arith.constant 0 : index
    %c0_10 = arith.constant 0 : index
    %17 = vector.load %arg3[%c2, %c0_9, %c0_10] : memref<3x4x8xf32, #tpu.memory_space<vmem>>, vector<1x4x8xf32>
    %18 = vector.shape_cast %17 : vector<1x4x8xf32> to vector<4x8xf32>
    %19 = vector.shape_cast %18 : vector<4x8xf32> to vector<1x4x8xf32>
    %20 = vector.broadcast %19 : vector<1x4x8xf32> to vector<14x4x8xf32>
    "tpu.trace_start"() <{level = 10 : i32, message = "tbh,thn->tbn"}> : () -> ()
    %cst_11 = arith.constant dense<0.000000e+00> : vector<14x2x8xf32>
    %21 = tpu.matmul %16, %20, %cst_11 {dimension_numbers = #tpu.dot_dimension_numbers<[2], [1], [1], [2], [0, 0, 0, 1, 1, 2], [0], [0]>} : vector<14x2x4xf32>, vector<14x4x8xf32>, vector<14x2x8xf32> -> vector<14x2x8xf32>
    "tpu.trace_stop"() : () -> ()
    %22 = arith.addf %15, %21 : vector<14x2x8xf32>
    %c0_12 = arith.constant 0 : index
    %c0_13 = arith.constant 0 : index
    %23 = vector.load %arg4[%c0_12, %c0_13] : memref<1x8xf32, #tpu.memory_space<vmem>>, vector<1x8xf32>
    %24 = vector.shape_cast %23 : vector<1x8xf32> to vector<1x1x8xf32>
    %25 = vector.broadcast %24 : vector<1x1x8xf32> to vector<14x2x8xf32>
    %26 = arith.addf %22, %25 : vector<14x2x8xf32>
    %cst_14 = arith.constant 0.000000e+00 : f32
    %27 = vector.broadcast %cst_14 : f32 to vector<14x2x8xf32>
    %28 = arith.maximumf %26, %27 : vector<14x2x8xf32>
    %c0_15 = arith.constant 0 : index
    %c0_16 = arith.constant 0 : index
    %c0_17 = arith.constant 0 : index
    %29 = vector.load %arg5[%c0_15, %c0_16, %c0_17] : memref<14x8x32xf32, #tpu.memory_space<vmem>>, vector<14x8x32xf32>
    "tpu.trace_start"() <{level = 10 : i32, message = "tbn,tnh->tbh"}> : () -> ()
    %cst_18 = arith.constant dense<0.000000e+00> : vector<14x2x32xf32>
    %30 = tpu.matmul %28, %29, %cst_18 {dimension_numbers = #tpu.dot_dimension_numbers<[2], [1], [1], [2], [0, 0, 0, 1, 1, 2], [0], [0]>} : vector<14x2x8xf32>, vector<14x8x32xf32>, vector<14x2x32xf32> -> vector<14x2x32xf32>
    "tpu.trace_stop"() : () -> ()
    %cst_19 = arith.constant dense<0.000000e+00> : vector<2x32xf32>
    %31 = vector.multi_reduction <add>, %30, %cst_19 [0] : vector<14x2x32xf32> to vector<2x32xf32>
    %c0_20 = arith.constant 0 : index
    %c0_21 = arith.constant 0 : index
    %32 = vector.load %arg6[%c0_20, %c0_21] : memref<1x32xf32, #tpu.memory_space<vmem>>, vector<1x32xf32>
    %33 = vector.broadcast %32 : vector<1x32xf32> to vector<2x32xf32>
    %34 = arith.addf %31, %33 : vector<2x32xf32>
    %cst_22 = arith.constant 0.000000e+00 : f32
    %35 = vector.broadcast %cst_22 : f32 to vector<2x32xf32>
    %36 = arith.maximumf %34, %35 : vector<2x32xf32>
    %c0_23 = arith.constant 0 : index
    %c0_24 = arith.constant 0 : index
    %37 = vector.load %arg7[%c0_23, %c0_24] : memref<32x128xf32, #tpu.memory_space<vmem>>, vector<32x128xf32>
    %cst_25 = arith.constant dense<0.000000e+00> : vector<2x128xf32>
    %38 = tpu.matmul %36, %37, %cst_25 {dimension_numbers = #tpu.dot_dimension_numbers<[1], [0], [0], [1], [0, 0, 1, 1], [], []>} : vector<2x32xf32>, vector<32x128xf32>, vector<2x128xf32> -> vector<2x128xf32>
    %c0_26 = arith.constant 0 : index
    %c0_27 = arith.constant 0 : index
    %39 = vector.load %arg8[%c0_26, %c0_27] : memref<1x128xf32, #tpu.memory_space<vmem>>, vector<1x128xf32>
    %40 = vector.broadcast %39 : vector<1x128xf32> to vector<2x128xf32>
    %41 = arith.addf %38, %40 : vector<2x128xf32>
    %c0_28 = arith.constant 0 : index
    %c0_29 = arith.constant 0 : index
    %42 = vector.load %arg9[%c0_28, %c0_29] : memref<2x128xf32, #tpu.memory_space<vmem>>, vector<2x128xf32>
    tpu.vector_store %arg9[%c0_28, %c0_29], %41 {strides = array<i32>} : memref<2x128xf32, #tpu.memory_space<vmem>>, vector<2x128xf32>,
    return
  }
  func.func @transform_0(%arg0: i32, %arg1: memref<1xi32, #tpu.memory_space<smem>>) -> (i32, i32, i32) {
    %c0_i32 = arith.constant 0 : i32
    %c0_i32_0 = arith.constant 0 : i32
    %c0_i32_1 = arith.constant 0 : i32
    %c0_i32_2 = arith.constant 0 : i32
    return %c0_i32, %c0_i32_0, %c0_i32_1 : i32, i32, i32
  }
  func.func @transform_1(%arg0: i32, %arg1: memref<1xi32, #tpu.memory_space<smem>>) -> (i32, i32, i32) {
    %c0_i32 = arith.constant 0 : i32
    %c0_i32_0 = arith.constant 0 : i32
    %c0_i32_1 = arith.constant 0 : i32
    %c0_i32_2 = arith.constant 0 : i32
    return %c0_i32, %c0_i32_0, %c0_i32_1 : i32, i32, i32
  }
  func.func @transform_2(%arg0: i32, %arg1: memref<1xi32, #tpu.memory_space<smem>>) -> (i32, i32) {
    %c0_i32 = arith.constant 0 : i32
    %c0_i32_0 = arith.constant 0 : i32
    %c0_i32_1 = arith.constant 0 : i32
    return %c0_i32, %c0_i32_0 : i32, i32
  }
  func.func @transform_3(%arg0: i32, %arg1: memref<1xi32, #tpu.memory_space<smem>>) -> (i32, i32, i32) {
    %c0_i32 = arith.constant 0 : i32
    %c0_i32_0 = arith.constant 0 : i32
    %c0_i32_1 = arith.constant 0 : i32
    %c0_i32_2 = arith.constant 0 : i32
    return %c0_i32, %c0_i32_0, %c0_i32_1 : i32, i32, i32
  }
  func.func @transform_4(%arg0: i32, %arg1: memref<1xi32, #tpu.memory_space<smem>>) -> (i32, i32) {
    %c0_i32 = arith.constant 0 : i32
    %c0_i32_0 = arith.constant 0 : i32
    %c0_i32_1 = arith.constant 0 : i32
    return %c0_i32, %c0_i32_0 : i32, i32
  }
  func.func @transform_5(%arg0: i32, %arg1: memref<1xi32, #tpu.memory_space<smem>>) -> (i32, i32) {
    %c0_i32 = arith.constant 0 : i32
    %c0_i32_0 = arith.constant 0 : i32
    %c0_i32_1 = arith.constant 0 : i32
    return %c0_i32, %c0_i32_0 : i32, i32
  }
  func.func @transform_6(%arg0: i32, %arg1: memref<1xi32, #tpu.memory_space<smem>>) -> (i32, i32) {
    %c0_i32 = arith.constant 0 : i32
    %c0_i32_0 = arith.constant 0 : i32
    %c0_i32_1 = arith.constant 0 : i32
    return %c0_i32, %c0_i32_0 : i32, i32
  }
  func.func @transform_7(%arg0: i32, %arg1: memref<1xi32, #tpu.memory_space<smem>>) -> (i32, i32) {
    %c0_i32 = arith.constant 0 : i32
    %c0_i32_0 = arith.constant 0 : i32
    %c0_i32_1 = arith.constant 0 : i32
    return %c0_i32, %c0_i32_0 : i32, i32
  }
}

</mosaic_0001>

<bundles_post_ra>
// kernel: tpu_custom_call.1
= control target key start
LH: loop header
LB: loop body
LE: loop exit
PB: predicated region body
PF: predicated region fallthrough
CT: control target
= control target key end

     0   :  { %14 = vsyncpa [#allocation5], 0  ;;  %s5452_s0 = inlined_call_operand.<no memory space> [shape: s32[1], index: 0, kind: input, shape index: {}]   ;;  %s5453_s1 = inlined_call_operand.vmem [shape: f32[16,2,4], index: 1, kind: input, shape index: {}]   ;;  %s5454_s2 = inlined_call_operand.vmem [shape: f32[3,4,8], index: 2, kind: input, shape index: {}]   ;;  %s5455_s3 = inlined_call_operand.vmem [shape: f32[1,8], index: 3, kind: input, shape index: {}]   ;;  %s5456_s4 = inlined_call_operand.hbm [shape: f32[14,8,32], index: 4, kind: input, shape index: {}]   ;;  %s5457_s5 = inlined_call_operand.vmem [shape: f32[1,32], index: 5, kind: input, shape index: {}]   ;;  %s5458_s6 = inlined_call_operand.vmem [shape: f32[32,128], index: 6, kind: input, shape index: {}]   ;;  %s5459_s7 = inlined_call_operand.vmem [shape: f32[1,128], index: 7, kind: input, shape index: {}]   ;;  %s5460_s8 = inlined_call_operand.hbm [shape: f32[2,128], index: 8, kind: output, shape index: {}]  }
   0x1   :  { %15 = vsyncpa [#allocation6], 0  ;;  %s4860_s26 = smov [#allocation4]   ;;  %s4812_s30 = scalar_lea.hbm %s5456_s4, 1792 }
   0x2   :  { %s27_s27 = sshll.u32 %s4860_s26, 4  ;;  %p4813_p0 = scmp.ne.s32.totalorder %s5456_s4, %s4812_s30  ;;  %s28_s27 = int_to_ptr.vmem [resolvable:$true] %s27_s27 }
   0x3   :  { %p4816_p1 = scmp.lt.u32.totalorder %s4812_s30, %s5456_s4 }
   0x5   :  { %p4818_p2 = pnand %p4816_p1, %p4813_p0 }
   0x7   :  { %4821 = shalt.err (!%p4818_p2)
}
   0x8   :  { %s4822_s13 = scalar_lea.vmem %s28_s27, 1792  ;;  %p4827_p4 = scmp.lt.s32.totalorder %s28_s27, %s28_s27 }
   0x9   :  { %p4823_p3 = scmp.ne.s32.totalorder %s28_s27, %s4822_s13  ;;  %p4828_p5 = scmp.lt.s32.totalorder %s4822_s13, %s4822_s13 }
   0xb   :  { %p4829_p6 = por %p4828_p5, %p4827_p4 }
   0xd   :  { %p4830_p7 = pnand %p4829_p6, %p4823_p3 }
   0xf   :  { %4833 = shalt.err (!%p4830_p7)
}
  0x10   :  { %s4861_s14 = smov 128   ;;  %s4862_s15 = smov 8  }
  0x11   :  { %33 = dma.hbm_to_vmem [thread:$0]  %s5456_s4, 1792, %s28_s27, [#allocation5], %s4861_s14, %s4861_s14, %s4862_s15  }
  0x12   :  { %4856 = dma.done.wait [#allocation5], 1792  }
  0x13   :  { %4857 = vsyncadd [#allocation5], 4294965504  ;;  %v4863_v0 = vmov 0.0   ;;  %vm4864_vm0 = vmmov 0   ;;  %vm66_vm1 = vcmask 1043456   ;;  %vm62_vm2 = vcmask 31744  }
  0x14   :  { %4508 = vmatprep.subr.mxu1 %v4863_v0  ;;  %4518 = vmatprep.subr.mxu0 %v4863_v0  ;;  %v4933_v1 = vld [vmem:[%s5454_s2 + $0x4] sm:$0xf]  ;;  %v4938_v2 = vld [vmem:[%s5453_s1 + $0x2] sm:$0x3]  ;;  %v4967_v5 = vld [vmem:[%s5453_s1 + $0xa] sm:$0x3] }
  0x15   :  { %4510 = vmatprep.mubr.msk.f32.mxu1 %vm4864_vm0, %v4863_v0  ;;  %4520 = vmatprep.mubr.msk.f32.mxu0 %vm4864_vm0, %v4863_v0  ;;  %v4943_v3 = vld [vmem:[%s5453_s1 + $0x6] sm:$0x3]  ;;  %v4959_v4 = vld [vmem:[%s5453_s1 + $0x4] sm:$0x3]  ;;  %v4983_v6 = vld [vmem:[%s5453_s1 + $0x8] sm:$0x3] }
  0x16   :  { %4509 = vmatpush3.msk.msra.mxu1 %vm66_vm1, %v4933_v1  ;;  %4519 = vmatpush3.msk.msra.mxu0 %vm66_vm1, %v4933_v1  ;;  %v4991_v7 = vld [vmem:[%s5453_s1 + $0xe] sm:$0x3]  ;;  %v5007_v8 = vld [vmem:[%s5453_s1 + $0xc] sm:$0x3]  ;;  %v5015_v9 = vld [vmem:[%s5453_s1 + $0x12] sm:$0x3] }
  0x17   :  { %4511 = vmatmul.mubr.msk.f32.vlgmr.msra.gmra.mrb[0].mxu1 %vm62_vm2, %v4938_v2  ;;  %4513 = vmatprep.subr.mxu1 %v4863_v0  ;;  %v5031_v10 = vld [vmem:[%s5453_s1 + $0x10] sm:$0x3]  ;;  %v5039_v11 = vld [vmem:[%s5453_s1 + $0x16] sm:$0x3]  ;;  %v5055_v12 = vld [vmem:[%s5453_s1 + $0x14] sm:$0x3] }
  0x18   :  { %4521 = vmatmul.mubr.msk.f32.vlgmr.msra.gmra.mrb[0].mxu0 %vm62_vm2, %v4943_v3  ;;  %4514 = vmatpush3.msk.msra.mxu1 %vm66_vm1, %v4933_v1  ;;  %v5063_v13 = vld [vmem:[%s5453_s1 + $0x1a] sm:$0x3]  ;;  %v5075_v14 = vld [vmem:[%s5454_s2] sm:$0xf]  ;;  %v5084_v15 = vld [vmem:[%s5453_s1 + $0x18] sm:$0x3] }
  0x19   :  { %4528 = vmatprep.subr.mxu0 %v4863_v0  ;;  %4515 = vmatprep.mubr.msk.f32.mxu1 %vm4864_vm0, %v4863_v0  ;;  %v43_v16 = vld [vmem:[%s5453_s1] sm:$0x3]  ;;  %v5105_v17 = vld [vmem:[%s5453_s1 + $0x1c] sm:$0x3]  ;;  %v5190_v18 = vld [vmem:[%s5454_s2 + $0x8] sm:$0xf] }
  0x1a   :  { %4529 = vmatpush3.msk.msra.mxu0 %vm66_vm1, %v4933_v1  ;;  %4530 = vmatprep.mubr.msk.f32.mxu0 %vm4864_vm0, %v4863_v0  ;;  %v58_v19 = vld [vmem:[%s5453_s1 + $0x1e] sm:$0x3]  ;;  %v3112_v20 = vld [vmem:[#allocation4] sm:$0xff]  ;;  %v3113_v21 = vld [vmem:[#allocation4 + $0x8] sm:$0xff]  ;;  %vm3126_vm3 = vcmask 64512   ;;  %vm4149_vm4 = vcmask 254976  }
  0x1b   :  { %4516 = vmatmul.mubr.msk.f32.vlgmr.msra.gmra.mrb[2].mxu1 %vm62_vm2, %v4959_v4  ;;  %4523 = vmatprep.subr.mxu1 %v4863_v0  ;;  %vm4197_vm5 = vcmask 261120   ;;  %s4866_s18 = smov [#allocation7]  }
  0x1c   :  { %4531 = vmatmul.mubr.msk.f32.vlgmr.msra.gmra.mrb[2].mxu0 %vm62_vm2, %v4967_v5  ;;  %4524 = vmatpush3.msk.msra.mxu1 %vm66_vm1, %v4933_v1  ;;  %s4278_s19 = sshll.u32 %s4866_s18, 4  ;;  %s4279_s19 = int_to_ptr.vmem [resolvable:$true] %s4278_s19 }
  0x1d   :  { %4538 = vmatprep.subr.mxu0 %v4863_v0  ;;  %4525 = vmatprep.mubr.msk.f32.mxu1 %vm4864_vm0, %v4863_v0  ;;  %s4834_s4 = scalar_lea.vmem %s4279_s19, 32  ;;  %p4839_p9 = scmp.lt.s32.totalorder %s4279_s19, %s4279_s19 }
  0x1e   :  { %4539 = vmatpush3.msk.msra.mxu0 %vm66_vm1, %v4933_v1  ;;  %4540 = vmatprep.mubr.msk.f32.mxu0 %vm4864_vm0, %v4863_v0  ;;  %p4835_p8 = scmp.ne.s32.totalorder %s4279_s19, %s4834_s4  ;;  %p4840_p10 = scmp.lt.s32.totalorder %s4834_s4, %s4834_s4 }
  0x1f   :  { %4526 = vmatmul.mubr.msk.f32.vlgmr.msra.gmra.mrb[4].mxu1 %vm62_vm2, %v4983_v6  ;;  %4533 = vmatprep.subr.mxu1 %v4863_v0 }
  0x20   :  { %4541 = vmatmul.mubr.msk.f32.vlgmr.msra.gmra.mrb[4].mxu0 %vm62_vm2, %v4991_v7  ;;  %4534 = vmatpush3.msk.msra.mxu1 %vm66_vm1, %v4933_v1  ;;  %p4841_p11 = por %p4840_p10, %p4839_p9 }
  0x21   :  { %4548 = vmatprep.subr.mxu0 %v4863_v0  ;;  %4535 = vmatprep.mubr.msk.f32.mxu1 %vm4864_vm0, %v4863_v0 }
  0x22   :  { %4549 = vmatpush3.msk.msra.mxu0 %vm66_vm1, %v4933_v1  ;;  %4550 = vmatprep.mubr.msk.f32.mxu0 %vm4864_vm0, %v4863_v0  ;;  %p4842_p12 = pnand %p4841_p11, %p4835_p8 }
  0x23   :  { %4536 = vmatmul.mubr.msk.f32.vlgmr.msra.gmra.mrb[6].mxu1 %vm62_vm2, %v5007_v8  ;;  %4543 = vmatprep.subr.mxu1 %v4863_v0 }
  0x24   :  { %4551 = vmatmul.mubr.msk.f32.vlgmr.msra.gmra.mrb[6].mxu0 %vm62_vm2, %v5015_v9  ;;  %4544 = vmatpush3.msk.msra.mxu1 %vm66_vm1, %v4933_v1 }
  0x25   :  { %4558 = vmatprep.subr.mxu0 %v4863_v0  ;;  %4545 = vmatprep.mubr.msk.f32.mxu1 %vm4864_vm0, %v4863_v0 }
  0x26   :  { %4559 = vmatpush3.msk.msra.mxu0 %vm66_vm1, %v4933_v1  ;;  %4560 = vmatprep.mubr.msk.f32.mxu0 %vm4864_vm0, %v4863_v0 }
  0x27   :  { %4546 = vmatmul.mubr.msk.f32.vlgmr.msra.gmra.mrb[8].mxu1 %vm62_vm2, %v5031_v10  ;;  %4553 = vmatprep.subr.mxu1 %v4863_v0 }
  0x28   :  { %4561 = vmatmul.mubr.msk.f32.vlgmr.msra.gmra.mrb[8].mxu0 %vm62_vm2, %v5039_v11  ;;  %4554 = vmatpush3.msk.msra.mxu1 %vm66_vm1, %v4933_v1 }
  0x29   :  { %4568 = vmatprep.subr.mxu0 %v4863_v0  ;;  %4555 = vmatprep.mubr.msk.f32.mxu1 %vm4864_vm0, %v4863_v0 }
  0x2a   :  { %4569 = vmatpush3.msk.msra.mxu0 %vm66_vm1, %v4933_v1  ;;  %4570 = vmatprep.mubr.msk.f32.mxu0 %vm4864_vm0, %v4863_v0 }
  0x2b   :  { %4556 = vmatmul.mubr.msk.f32.vlgmr.msra.gmra.mrb[10].mxu1 %vm62_vm2, %v5055_v12  ;;  %4563 = vmatprep.subr.mxu1 %v4863_v0 }
  0x2c   :  { %4571 = vmatmul.mubr.msk.f32.vlgmr.msra.gmra.mrb[10].mxu0 %vm62_vm2, %v5063_v13  ;;  %4564 = vmatpush3.msk.msra.mxu1 %vm66_vm1, %v4933_v1 }
  0x2d   :  { %4578 = vmatprep.subr.mxu0 %v4863_v0  ;;  %4565 = vmatprep.mubr.msk.f32.mxu1 %vm4864_vm0, %v4863_v0 }
  0x2e   :  { %4579 = vmatpush3.msk.msra.mxu0 %vm66_vm1, %v5075_v14  ;;  %4580 = vmatprep.mubr.msk.f32.mxu0 %vm4864_vm0, %v4863_v0 }
  0x2f   :  { %4566 = vmatmul.mubr.msk.f32.vlgmr.msra.gmra.mrb[12].mxu1 %vm62_vm2, %v5084_v15  ;;  %4573 = vmatprep.subr.mxu1 %v4863_v0 }
  0x30   :  { %4581 = vmatmul.mubr.msk.f32.vlgmr.msra.gmra.mrb[12].mxu0 %vm62_vm2, %v43_v16  ;;  %4574 = vmatpush3.msk.msra.mxu1 %vm66_vm1, %v4933_v1 }
  0x31   :  { %4588 = vmatprep.subr.mxu0 %v4863_v0  ;;  %4575 = vmatprep.mubr.msk.f32.mxu1 %vm4864_vm0, %v4863_v0 }
  0x32   :  { %4589 = vmatpush3.msk.msra.mxu0 %vm66_vm1, %v5075_v14  ;;  %4590 = vmatprep.mubr.msk.f32.mxu0 %vm4864_vm0, %v4863_v0 }
  0x33   :  { %4576 = vmatmul.mubr.msk.f32.vlgmr.msra.gmra.mrb[14].mxu1 %vm62_vm2, %v5105_v17  ;;  %4583 = vmatprep.subr.mxu1 %v4863_v0 }
  0x34   :  { %4591 = vmatmul.mubr.msk.f32.vlgmr.msra.gmra.mrb[14].mxu0 %vm62_vm2, %v4959_v4  ;;  %4584 = vmatpush3.msk.msra.mxu1 %vm66_vm1, %v5075_v14 }
  0x35   :  { %4598 = vmatprep.subr.mxu0 %v4863_v0  ;;  %4585 = vmatprep.mubr.msk.f32.mxu1 %vm4864_vm0, %v4863_v0 }
  0x36   :  { %4599 = vmatpush3.msk.msra.mxu0 %vm66_vm1, %v5075_v14  ;;  %4600 = vmatprep.mubr.msk.f32.mxu0 %vm4864_vm0, %v4863_v0 }
  0x37   :  { %4586 = vmatmul.mubr.msk.f32.vlgmr.msra.gmra.mrb[16].mxu1 %vm62_vm2, %v4938_v2  ;;  %4593 = vmatprep.subr.mxu1 %v4863_v0 }
  0x38   :  { %4601 = vmatmul.mubr.msk.f32.vlgmr.msra.gmra.mrb[16].mxu0 %vm62_vm2, %v4983_v6  ;;  %4594 = vmatpush3.msk.msra.mxu1 %vm66_vm1, %v5075_v14 }
  0x39   :  { %4608 = vmatprep.subr.mxu0 %v4863_v0  ;;  %4595 = vmatprep.mubr.msk.f32.mxu1 %vm4864_vm0, %v4863_v0 }
  0x3a   :  { %4609 = vmatpush3.msk.msra.mxu0 %vm66_vm1, %v5075_v14  ;;  %4610 = vmatprep.mubr.msk.f32.mxu0 %vm4864_vm0, %v4863_v0 }
  0x3b   :  { %4596 = vmatmul.mubr.msk.f32.vlgmr.msra.gmra.mrb[18].mxu1 %vm62_vm2, %v4943_v3  ;;  %4603 = vmatprep.subr.mxu1 %v4863_v0 }
  0x3c   :  { %4611 = vmatmul.mubr.msk.f32.vlgmr.msra.gmra.mrb[18].mxu0 %vm62_vm2, %v5007_v8  ;;  %4604 = vmatpush3.msk.msra.mxu1 %vm66_vm1, %v5075_v14 }
  0x3d   :  { %4618 = vmatprep.subr.mxu0 %v4863_v0  ;;  %4605 = vmatprep.mubr.msk.f32.mxu1 %vm4864_vm0, %v4863_v0 }
  0x3e   :  { %4619 = vmatpush3.msk.msra.mxu0 %vm66_vm1, %v5075_v14  ;;  %4620 = vmatprep.mubr.msk.f32.mxu0 %vm4864_vm0, %v4863_v0 }
  0x3f   :  { %4606 = vmatmul.mubr.msk.f32.vlgmr.msra.gmra.mrb[20].mxu1 %vm62_vm2, %v4967_v5  ;;  %4613 = vmatprep.subr.mxu1 %v4863_v0 }
  0x40   :  { %4621 = vmatmul.mubr.msk.f32.vlgmr.msra.gmra.mrb[20].mxu0 %vm62_vm2, %v5031_v10  ;;  %4614 = vmatpush3.msk.msra.mxu1 %vm66_vm1, %v5075_v14 }
  0x41   :  { %4628 = vmatprep.subr.mxu0 %v4863_v0  ;;  %4615 = vmatprep.mubr.msk.f32.mxu1 %vm4864_vm0, %v4863_v0 }
  0x42   :  { %4629 = vmatpush3.msk.msra.mxu0 %vm66_vm1, %v5075_v14  ;;  %4630 = vmatprep.mubr.msk.f32.mxu0 %vm4864_vm0, %v4863_v0 }
  0x43   :  { %4616 = vmatmul.mubr.msk.f32.vlgmr.msra.gmra.mrb[22].mxu1 %vm62_vm2, %v4991_v7  ;;  %4623 = vmatprep.subr.mxu1 %v4863_v0 }
  0x44   :  { %4631 = vmatmul.mubr.msk.f32.vlgmr.msra.gmra.mrb[22].mxu0 %vm62_vm2, %v5055_v12  ;;  %4624 = vmatpush3.msk.msra.mxu1 %vm66_vm1, %v5075_v14 }
  0x45   :  { %4638 = vmatprep.subr.mxu0 %v4863_v0  ;;  %4625 = vmatprep.mubr.msk.f32.mxu1 %vm4864_vm0, %v4863_v0 }
  0x46   :  { %4639 = vmatpush3.msk.msra.mxu0 %vm66_vm1, %v5075_v14  ;;  %4640 = vmatprep.mubr.msk.f32.mxu0 %vm4864_vm0, %v4863_v0 }
  0x47   :  { %4626 = vmatmul.mubr.msk.f32.vlgmr.msra.gmra.mrb[24].mxu1 %vm62_vm2, %v5015_v9  ;;  %4633 = vmatprep.subr.mxu1 %v4863_v0 }
  0x48   :  { %4641 = vmatmul.mubr.msk.f32.vlgmr.msra.gmra.mrb[24].mxu0 %vm62_vm2, %v5084_v15  ;;  %4634 = vmatpush3.msk.msra.mxu1 %vm66_vm1, %v5075_v14 }
  0x49   :  { %4648 = vmatprep.subr.mxu0 %v4863_v0  ;;  %4635 = vmatprep.mubr.msk.f32.mxu1 %vm4864_vm0, %v4863_v0 }
  0x4a   :  { %4649 = vmatpush3.msk.msra.mxu0 %vm66_vm1, %v5190_v18  ;;  %4650 = vmatprep.mubr.msk.f32.mxu0 %vm4864_vm0, %v4863_v0 }
  0x4b   :  { %4636 = vmatmul.mubr.msk.f32.vlgmr.msra.gmra.mrb[26].mxu1 %vm62_vm2, %v5039_v11  ;;  %4643 = vmatprep.subr.mxu1 %v4863_v0 }
  0x4c   :  { %4651 = vmatmul.mubr.msk.f32.vlgmr.msra.gmra.mrb[26].mxu0 %vm62_vm2, %v4959_v4  ;;  %4644 = vmatpush3.msk.msra.mxu1 %vm66_vm1, %v5075_v14 }
  0x4d   :  { %4658 = vmatprep.subr.mxu0 %v4863_v0  ;;  %4645 = vmatprep.mubr.msk.f32.mxu1 %vm4864_vm0, %v4863_v0 }
  0x4e   :  { %4659 = vmatpush3.msk.msra.mxu0 %vm66_vm1, %v5190_v18  ;;  %4660 = vmatprep.mubr.msk.f32.mxu0 %vm4864_vm0, %v4863_v0 }
  0x4f   :  { %4646 = vmatmul.mubr.msk.f32.vlgmr.msra.gmra.mrb[28].mxu1 %vm62_vm2, %v5063_v13  ;;  %4653 = vmatprep.subr.mxu1 %v4863_v0 }
  0x50   :  { %4661 = vmatmul.mubr.msk.f32.vlgmr.msra.gmra.mrb[28].mxu0 %vm62_vm2, %v4983_v6  ;;  %4654 = vmatpush3.msk.msra.mxu1 %vm66_vm1, %v5190_v18 }
  0x51   :  { %4668 = vmatprep.subr.mxu0 %v4863_v0  ;;  %4655 = vmatprep.mubr.msk.f32.mxu1 %vm4864_vm0, %v4863_v0 }
  0x52   :  { %4669 = vmatpush3.msk.msra.mxu0 %vm66_vm1, %v5190_v18  ;;  %4670 = vmatprep.mubr.msk.f32.mxu0 %vm4864_vm0, %v4863_v0 }
  0x53   :  { %4656 = vmatmul.mubr.msk.f32.vlgmr.msra.gmra.mrb[30].mxu1 %vm62_vm2, %v4943_v3  ;;  %4663 = vmatprep.subr.mxu1 %v4863_v0 }
  0x54   :  { %4671 = vmatmul.mubr.msk.f32.vlgmr.msra.gmra.mrb[30].mxu0 %vm62_vm2, %v5007_v8  ;;  %4664 = vmatpush3.msk.msra.mxu1 %vm66_vm1, %v5190_v18 }
  0x55   :  { %4678 = vmatprep.subr.mxu0 %v4863_v0  ;;  %4665 = vmatprep.mubr.msk.f32.mxu1 %vm4864_vm0, %v4863_v0 }
  0x56   :  { %4679 = vmatpush3.msk.msra.mxu0 %vm66_vm1, %v5190_v18  ;;  %4680 = vmatprep.mubr.msk.f32.mxu0 %vm4864_vm0, %v4863_v0 }
  0x57   :  { %4666 = vmatmul.mubr.msk.f32.vlgmr.msra.gmra.mrb[32].mxu1 %vm62_vm2, %v4967_v5  ;;  %4673 = vmatprep.subr.mxu1 %v4863_v0 }
  0x58   :  { %4681 = vmatmul.mubr.msk.f32.vlgmr.msra.gmra.mrb[32].mxu0 %vm62_vm2, %v5031_v10  ;;  %4674 = vmatpush3.msk.msra.mxu1 %vm66_vm1, %v5190_v18 }
  0x59   :  { %4688 = vmatprep.subr.mxu0 %v4863_v0  ;;  %4675 = vmatprep.mubr.msk.f32.mxu1 %vm4864_vm0, %v4863_v0 }
  0x5a   :  { %4689 = vmatpush3.msk.msra.mxu0 %vm66_vm1, %v5190_v18  ;;  %4690 = vmatprep.mubr.msk.f32.mxu0 %vm4864_vm0, %v4863_v0 }
  0x5b   :  { %4676 = vmatmul.mubr.msk.f32.vlgmr.msra.gmra.mrb[34].mxu1 %vm62_vm2, %v4991_v7  ;;  %4683 = vmatprep.subr.mxu1 %v4863_v0 }
  0x5c   :  { %4691 = vmatmul.mubr.msk.f32.vlgmr.msra.gmra.mrb[34].mxu0 %vm62_vm2, %v5055_v12  ;;  %4684 = vmatpush3.msk.msra.mxu1 %vm66_vm1, %v5190_v18 }
  0x5d   :  { %4698 = vmatprep.subr.mxu0 %v4863_v0  ;;  %4685 = vmatprep.mubr.msk.f32.mxu1 %vm4864_vm0, %v4863_v0 }
  0x5e   :  { %4699 = vmatpush3.msk.msra.mxu0 %vm66_vm1, %v5190_v18  ;;  %4700 = vmatprep.mubr.msk.f32.mxu0 %vm4864_vm0, %v4863_v0 }
  0x5f   :  { %4686 = vmatmul.mubr.msk.f32.vlgmr.msra.gmra.mrb[36].mxu1 %vm62_vm2, %v5015_v9  ;;  %4693 = vmatprep.subr.mxu1 %v4863_v0 }
  0x60   :  { %4701 = vmatmul.mubr.msk.f32.vlgmr.msra.gmra.mrb[36].mxu0 %vm62_vm2, %v5084_v15  ;;  %4694 = vmatpush3.msk.msra.mxu1 %vm66_vm1, %v5190_v18 }
  0x61   :  { %4708 = vmatprep.subr.mxu0 %v4863_v0  ;;  %4695 = vmatprep.mubr.msk.f32.mxu1 %vm4864_vm0, %v4863_v0 }
  0x62   :  { %4709 = vmatpush3.msk.msra.mxu0 %vm66_vm1, %v5190_v18  ;;  %4710 = vmatprep.mubr.msk.f32.mxu0 %vm4864_vm0, %v4863_v0 }
  0x63   :  { %4696 = vmatmul.mubr.msk.f32.vlgmr.msra.gmra.mrb[38].mxu1 %vm62_vm2, %v5039_v11  ;;  %4703 = vmatprep.subr.mxu1 %v4863_v0 }
  0x64   :  { %4711 = vmatmul.mubr.msk.f32.vlgmr.msra.gmra.mrb[38].mxu0 %vm62_vm2, %v5105_v17  ;;  %4704 = vmatpush3.msk.msra.mxu1 %vm66_vm1, %v5190_v18 }
  0x65   :  { %4705 = vmatprep.mubr.msk.f32.mxu1 %vm4864_vm0, %v4863_v0  ;;  %4713 = vmatprep.subr.mxu1 %v4863_v0 }
  0x66   :  { %4718 = vmatprep.subr.mxu0 %v4863_v0  ;;  %4720 = vmatprep.mubr.msk.f32.mxu0 %vm4864_vm0, %v4863_v0 }
  0x67   :  { %4706 = vmatmul.mubr.msk.f32.vlgmr.msra.gmra.mrb[40].mxu1 %vm62_vm2, %v5063_v13  ;;  %4719 = vmatpush3.msra.mxu0 %v3112_v20 }
  0x68   :  { %4714 = vmatpush3.msk.msra.mxu1 %vm66_vm1, %v5190_v18  ;;  %4715 = vmatprep.mubr.msk.f32.mxu1 %vm4864_vm0, %v4863_v0 }
  0x69   :  { %4723 = vmatprep.subr.mxu1 %v4863_v0  ;;  %4728 = vmatprep.subr.mxu0 %v4863_v0 }
  0x6b   :  { %4716 = vmatmul.mubr.msk.f32.vlgmr.msra.gmra.mrb[42].mxu1 %vm62_vm2, %v58_v19 }
  0x6c   :  { %4725 = vmatprep.mubr.msk.f32.mxu1 %vm4864_vm0, %v4863_v0  ;;  %4724 = vmatpush3.msra.mxu1 %v3113_v21 }
  0x6d   :  { %4733 = vmatprep.subr.mxu1 %v4863_v0 }
  0xea   :  { %v136_v22 = vpop.f32.mrb[0].mxu1 }
  0xeb   :  { %v4512_v23 = vpop.f32.mrb[1].mxu1  ;;  %v282_v24 = vpop.f32.mrb[0].mxu0 }
  0xec   :  { %v4522_v25 = vpop.f32.mrb[1].mxu0 }
  0xee   :  { %v209_v26 = vpop.f32.mrb[2].mxu1 }
  0xef   :  { %v4517_v27 = vpop.f32.mrb[3].mxu1  ;;  %v428_v28 = vpop.f32.mrb[2].mxu0 }
  0xf0   :  { %v4532_v29 = vpop.f32.mrb[3].mxu0 }
  0xf2   :  { %v355_v30 = vpop.f32.mrb[4].mxu1 }
  0xf3   :  { %v4527_v31 = vpop.f32.mrb[5].mxu1  ;;  %v574_v32 = vpop.f32.mrb[4].mxu0 }
  0xf4   :  { %v4542_v33 = vpop.f32.mrb[5].mxu0 }
  0xf6   :  { %v501_v34 = vpop.f32.mrb[6].mxu1 }
  0xf7   :  { %v4537_v35 = vpop.f32.mrb[7].mxu1  ;;  %v720_v36 = vpop.f32.mrb[6].mxu0 }
  0xf8   :  { %v4552_v37 = vpop.f32.mrb[7].mxu0 }
  0xfa   :  { %v647_v38 = vpop.f32.mrb[8].mxu1 }
  0xfb   :  { %v4547_v39 = vpop.f32.mrb[9].mxu1  ;;  %v866_v40 = vpop.f32.mrb[8].mxu0 }
  0xfc   :  { %v4562_v41 = vpop.f32.mrb[9].mxu0 }
  0xfe   :  { %v793_v42 = vpop.f32.mrb[10].mxu1 }
  0xff   :  { %v4557_v43 = vpop.f32.mrb[11].mxu1  ;;  %v1012_v44 = vpop.f32.mrb[10].mxu0 }
 0x100   :  { %v4572_v45 = vpop.f32.mrb[11].mxu0 }
 0x102   :  { %v939_v46 = vpop.f32.mrb[12].mxu1 }
 0x103   :  { %v1161_v47 = vpop.f32.mrb[12].mxu0  ;;  %v4567_v48 = vpop.f32.mrb[13].mxu1 }
 0x104   :  { %v1162_v49 = vadd.f32 %v1161_v47, %v136_v22  ;;  %v4582_v50 = vpop.f32.mrb[13].mxu0  ;;  %v3116_v47 = vld [vmem:[#allocation4 + $0x20] sm:$0xff] }
 0x106   :  { %v1085_v51 = vpop.f32.mrb[14].mxu1 }
 0x107   :  { %v1301_v52 = vpop.f32.mrb[14].mxu0  ;;  %v4577_v53 = vpop.f32.mrb[15].mxu1 }
 0x108   :  { %v1302_v54 = vadd.f32 %v1301_v52, %v282_v24  ;;  %v4592_v55 = vpop.f32.mrb[15].mxu0 }
 0x109   :  { %v3115_v55 = vld [vmem:[#allocation4 + $0x18] sm:$0xff] }
 0x10a   :  { %v1231_v56 = vpop.f32.mrb[16].mxu1 }
 0x10b   :  { %v1232_v57 = vadd.f32 %v1231_v56, %v209_v26  ;;  %v1441_v58 = vpop.f32.mrb[16].mxu0  ;;  %v4587_v59 = vpop.f32.mrb[17].mxu1  ;;  %v5332_v26 = vld [vmem:[%s5455_s3] ss:$0 sm:$0xff] }
 0x10c   :  { %v1442_v60 = vadd.f32 %v1441_v58, %v428_v28  ;;  %v4602_v61 = vpop.f32.mrb[17].mxu0  ;;  %v3118_v59 = vld [vmem:[#allocation4 + $0x30] sm:$0xff] }
 0x10e   :  { %v1371_v62 = vpop.f32.mrb[18].mxu1 }
 0x10f   :  { %v1372_v63 = vadd.f32 %v1371_v62, %v355_v30  ;;  %v1581_v1 = vpop.f32.mrb[18].mxu0  ;;  %v4597_v2 = vpop.f32.mrb[19].mxu1 }
 0x110   :  { %v1582_v3 = vadd.f32 %v1581_v1, %v574_v32  ;;  %v4612_v4 = vpop.f32.mrb[19].mxu0 }
 0x112   :  { %v1511_v5 = vpop.f32.mrb[20].mxu1 }
 0x113   :  { %v5315_v6 = vadd.f32 %v1511_v5, %v501_v34  ;;  %v1721_v7 = vpop.f32.mrb[20].mxu0  ;;  %v4607_v8 = vpop.f32.mrb[21].mxu1 }
 0x114   :  { %v5317_v9 = vadd.f32 %v1721_v7, %v720_v36  ;;  %v4622_v10 = vpop.f32.mrb[21].mxu0 }
 0x115   :  { %v3120_v10 = vld [vmem:[#allocation4 + $0x40] sm:$0xff] }
 0x116   :  { %v1651_v11 = vpop.f32.mrb[22].mxu1 }
 0x117   :  { %v5319_v12 = vadd.f32 %v1651_v11, %v647_v38  ;;  %v1861_v13 = vpop.f32.mrb[22].mxu0  ;;  %v4617_v14 = vpop.f32.mrb[23].mxu1  ;;  %v3114_v38 = vld [vmem:[#allocation4 + $0x10] sm:$0xff] }
 0x118   :  { %v5321_v15 = vadd.f32 %v1861_v13, %v866_v40  ;;  %v4632_v16 = vpop.f32.mrb[23].mxu0 }
 0x11a   :  { %v1791_v17 = vpop.f32.mrb[24].mxu1 }
 0x11b   :  { %v5323_v18 = vadd.f32 %v1791_v17, %v793_v42  ;;  %v2001_v19 = vpop.f32.mrb[24].mxu0  ;;  %v4627_v20 = vpop.f32.mrb[25].mxu1 }
 0x11c   :  { %v5325_v21 = vadd.f32 %v2001_v19, %v1012_v44  ;;  %v4642_v22 = vpop.f32.mrb[25].mxu0  ;;  %v3119_v19 = vld [vmem:[#allocation4 + $0x38] sm:$0xff] }
 0x11e   :  { %v1931_v23 = vpop.f32.mrb[26].mxu1 }
 0x11f   :  { %v5327_v24 = vadd.f32 %v1931_v23, %v939_v46  ;;  %v2146_v25 = vpop.f32.mrb[26].mxu0  ;;  %v4637_v27 = vpop.f32.mrb[27].mxu1 }
 0x120   :  { %v3063_v28 = vadd.f32 %v2146_v25, %v1162_v49  ;;  %v4652_v29 = vpop.f32.mrb[27].mxu0  ;;  %v3122_v25 = vld [vmem:[#allocation4 + $0x50] sm:$0xff] }
 0x122   :  { %v3084_v30 = vadd.f32 %v5332_v26, %v3063_v28  ;;  %v2071_v31 = vpop.f32.mrb[28].mxu1 }
 0x123   :  { %v5335_v32 = vadd.f32 %v2071_v31, %v1085_v51  ;;  %v2286_v33 = vpop.f32.mrb[28].mxu0  ;;  %v4647_v34 = vpop.f32.mrb[29].mxu1 }
 0x124   :  { %v3098_v35 = vmax.f32 %v3084_v30, 0.0  ;;  %v3065_v36 = vadd.f32 %v2286_v33, %v1302_v54  ;;  %v4662_v37 = vpop.f32.mrb[29].mxu0  ;;  %v3121_v33 = vld [vmem:[#allocation4 + $0x48] sm:$0xff] }
 0x126   :  { %v3086_v39 = vadd.f32 %v5332_v26, %v3065_v36  ;;  %4721 = vmatmul.mubr.msk.f32.vlgmr.msra.gmra.mrb[40].mxu0 %vm3126_vm3, %v3098_v35  ;;  %v2216_v40 = vpop.f32.mrb[30].mxu1  ;;  %v3124_v36 = vld [vmem:[#allocation4 + $0x60] sm:$0xff] }
 0x127   :  { %v3064_v41 = vadd.f32 %v2216_v40, %v1232_v57  ;;  %v2426_v42 = vpop.f32.mrb[30].mxu0  ;;  %v4657_v43 = vpop.f32.mrb[31].mxu1  ;;  %4729 = vmatpush3.msra.mxu0 %v3114_v38  ;;  %4730 = vmatprep.mubr.msk.f32.mxu0 %vm4864_vm0, %v4863_v0 }
 0x128   :  { %v3100_v44 = vmax.f32 %v3086_v39, 0.0  ;;  %v3067_v45 = vadd.f32 %v2426_v42, %v1442_v60  ;;  %v4672_v46 = vpop.f32.mrb[31].mxu0  ;;  %4738 = vmatprep.subr.mxu0 %v4863_v0  ;;  %v3123_v42 = vld [vmem:[#allocation4 + $0x58] sm:$0xff] }
 0x129   :  { %v3085_v48 = vadd.f32 %v5332_v26, %v3064_v41 }
 0x12a   :  { %v3088_v49 = vadd.f32 %v5332_v26, %v3067_v45  ;;  %4731 = vmatmul.mubr.msk.f32.vlgmr.msra.gmra.mrb[42].mxu0 %vm3126_vm3, %v3100_v44  ;;  %v2356_v50 = vpop.f32.mrb[32].mxu1 }
 0x12b   :  { %v3099_v51 = vmax.f32 %v3085_v48, 0.0  ;;  %v3066_v52 = vadd.f32 %v2356_v50, %v1372_v63  ;;  %v2566_v53 = vpop.f32.mrb[32].mxu0  ;;  %v4667_v54 = vpop.f32.mrb[33].mxu1  ;;  %4739 = vmatpush3.msra.mxu0 %v3116_v47  ;;  %4740 = vmatprep.mubr.msk.f32.mxu0 %vm4864_vm0, %v4863_v0  ;;  %v3125_v48 = vld [vmem:[#allocation4 + $0x68] sm:$0xff] }
 0x12c   :  { %v3102_v56 = vmax.f32 %v3088_v49, 0.0  ;;  %v3069_v57 = vadd.f32 %v2566_v53, %v1582_v3  ;;  %v4682_v58 = vpop.f32.mrb[33].mxu0  ;;  %4748 = vmatprep.subr.mxu0 %v4863_v0  ;;  %v3117_v3 = vld [vmem:[#allocation4 + $0x28] sm:$0xff]  ;;  %v4865_v53 = vmov 0.0|0.0  }
 0x12d   :  { %v3087_v60 = vadd.f32 %v5332_v26, %v3066_v52  ;;  %4726 = vmatmul.mubr.msk.f32.vlgmr.msra.gmra.mrb[44].mxu1 %vm3126_vm3, %v3099_v51  ;;  %v4187_v51 = vld [vmem:[%s5458_s6 + $0x8] sm:$0xff] }
 0x12e   :  { %v3090_v61 = vadd.f32 %v5332_v26, %v3069_v57  ;;  %4741 = vmatmul.mubr.msk.f32.vlgmr.msra.gmra.mrb[44].mxu0 %vm3126_vm3, %v3102_v56  ;;  %v2496_v62 = vpop.f32.mrb[34].mxu1  ;;  %4734 = vmatpush3.msra.mxu1 %v3115_v55 }
 0x12f   :  { %v3101_v63 = vmax.f32 %v3087_v60, 0.0  ;;  %v3068_v1 = vadd.f32 %v2496_v62, %v5315_v6  ;;  %v2706_v2 = vpop.f32.mrb[34].mxu0  ;;  %v4677_v4 = vpop.f32.mrb[35].mxu1  ;;  %4735 = vmatprep.mubr.msk.f32.mxu1 %vm4864_vm0, %v4863_v0  ;;  %4749 = vmatpush3.msra.mxu0 %v3118_v59 }
 0x130   :  { %v3104_v5 = vmax.f32 %v3090_v61, 0.0  ;;  %v3071_v7 = vadd.f32 %v2706_v2, %v5317_v9  ;;  %4750 = vmatprep.mubr.msk.f32.mxu0 %vm4864_vm0, %v4863_v0  ;;  %v4692_v8 = vpop.f32.mrb[35].mxu0  ;;  %4743 = vmatprep.subr.mxu1 %v4863_v0 }
 0x131   :  { %v3089_v11 = vadd.f32 %v5332_v26, %v3068_v1  ;;  %4736 = vmatmul.mubr.msk.f32.vlgmr.msra.gmra.mrb[46].mxu1 %vm3126_vm3, %v3101_v63  ;;  %4758 = vmatprep.subr.mxu0 %v4863_v0 }
 0x132   :  { %v3092_v6 = vadd.f32 %v5332_v26, %v3071_v7  ;;  %4751 = vmatmul.mubr.msk.f32.vlgmr.msra.gmra.mrb[46].mxu0 %vm3126_vm3, %v3104_v5  ;;  %v2636_v13 = vpop.f32.mrb[36].mxu1  ;;  %4744 = vmatpush3.msra.mxu1 %v3117_v3 }
 0x133   :  { %v3103_v9 = vmax.f32 %v3089_v11, 0.0  ;;  %v3070_v14 = vadd.f32 %v2636_v13, %v5319_v12  ;;  %v2846_v16 = vpop.f32.mrb[36].mxu0  ;;  %v4687_v17 = vpop.f32.mrb[37].mxu1  ;;  %4745 = vmatprep.mubr.msk.f32.mxu1 %vm4864_vm0, %v4863_v0  ;;  %4759 = vmatpush3.msra.mxu0 %v3120_v10 }
 0x134   :  { %v3106_v20 = vmax.f32 %v3092_v6, 0.0  ;;  %v3073_v22 = vadd.f32 %v2846_v16, %v5321_v15  ;;  %4760 = vmatprep.mubr.msk.f32.mxu0 %vm4864_vm0, %v4863_v0  ;;  %v4702_v23 = vpop.f32.mrb[37].mxu0  ;;  %4753 = vmatprep.subr.mxu1 %v4863_v0 }
 0x135   :  { %v3091_v27 = vadd.f32 %v5332_v26, %v3070_v14  ;;  %4746 = vmatmul.mubr.msk.f32.vlgmr.msra.gmra.mrb[48].mxu1 %vm3126_vm3, %v3103_v9  ;;  %4768 = vmatprep.subr.mxu0 %v4863_v0 }
 0x136   :  { %v3094_v12 = vadd.f32 %v5332_v26, %v3073_v22  ;;  %4761 = vmatmul.mubr.msk.f32.vlgmr.msra.gmra.mrb[48].mxu0 %vm3126_vm3, %v3106_v20  ;;  %v2776_v28 = vpop.f32.mrb[38].mxu1  ;;  %4754 = vmatpush3.msra.mxu1 %v3119_v19 }
 0x137   :  { %v3105_v15 = vmax.f32 %v3091_v27, 0.0  ;;  %v3072_v29 = vadd.f32 %v2776_v28, %v5323_v18  ;;  %v2986_v30 = vpop.f32.mrb[38].mxu0  ;;  %v4697_v31 = vpop.f32.mrb[39].mxu1  ;;  %4755 = vmatprep.mubr.msk.f32.mxu1 %vm4864_vm0, %v4863_v0  ;;  %4769 = vmatpush3.msra.mxu0 %v3122_v25 }
 0x138   :  { %v3108_v34 = vmax.f32 %v3094_v12, 0.0  ;;  %v3075_v35 = vadd.f32 %v2986_v30, %v5325_v21  ;;  %4770 = vmatprep.mubr.msk.f32.mxu0 %vm4864_vm0, %v4863_v0  ;;  %4763 = vmatprep.subr.mxu1 %v4863_v0  ;;  %v4712_v37 = vpop.f32.mrb[39].mxu0 }
 0x139   :  { %v3093_v38 = vadd.f32 %v5332_v26, %v3072_v29  ;;  %4756 = vmatmul.mubr.msk.f32.vlgmr.msra.gmra.mrb[50].mxu1 %vm3126_vm3, %v3105_v15  ;;  %4778 = vmatprep.subr.mxu0 %v4863_v0 }
 0x13a   :  { %v3096_v18 = vadd.f32 %v5332_v26, %v3075_v35  ;;  %4771 = vmatmul.mubr.msk.f32.vlgmr.msra.gmra.mrb[50].mxu0 %vm3126_vm3, %v3108_v34  ;;  %v2916_v39 = vpop.f32.mrb[40].mxu1  ;;  %4764 = vmatpush3.msra.mxu1 %v3121_v33 }
 0x13b   :  { %v3107_v21 = vmax.f32 %v3093_v38, 0.0  ;;  %v3074_v40 = vadd.f32 %v2916_v39, %v5327_v24  ;;  %v4707_v41 = vpop.f32.mrb[41].mxu1  ;;  %4765 = vmatprep.mubr.msk.f32.mxu1 %vm4864_vm0, %v4863_v0  ;;  %4779 = vmatpush3.msra.mxu0 %v3124_v36 }
 0x13c   :  { %v3110_v43 = vmax.f32 %v3096_v18, 0.0  ;;  %4780 = vmatprep.mubr.msk.f32.mxu0 %vm4864_vm0, %v4863_v0  ;;  %4773 = vmatprep.subr.mxu1 %v4863_v0 }
 0x13d   :  { %v3095_v44 = vadd.f32 %v5332_v26, %v3074_v40  ;;  %4766 = vmatmul.mubr.msk.f32.vlgmr.msra.gmra.mrb[52].mxu1 %vm3126_vm3, %v3107_v21  ;;  %4799 = vmatprep.subr.bf16.mxu0 %v4865_v53 }
 0x13e   :  { %4781 = vmatmul.mubr.msk.f32.vlgmr.msra.gmra.mrb[52].mxu0 %vm3126_vm3, %v3110_v43  ;;  %v3059_v45 = vpop.f32.mrb[42].mxu1  ;;  %4774 = vmatpush3.msra.mxu1 %v3123_v42 }
 0x13f   :  { %v3109_v24 = vmax.f32 %v3095_v44, 0.0  ;;  %v3076_v46 = vadd.f32 %v3059_v45, %v5335_v32  ;;  %v4717_v47 = vpop.f32.mrb[43].mxu1  ;;  %4775 = vmatprep.mubr.msk.f32.mxu1 %vm4864_vm0, %v4863_v0  ;;  %4783 = vmatprep.subr.mxu1 %v4863_v0  ;;  %v4186_v32 = vld [vmem:[%s5458_s6] sm:$0xff] }
 0x140   :  { %4796 = vmatprep.mubr.msk.f32.mxu0 %vm4864_vm0, %v4863_v0  ;;  %v4800_v52 = vpack.c.bf16 %v4187_v51, %v4186_v32  ;;  %v4388_v47 = vld [vmem:[%s5457_s5] ss:$0 sm:$0xff] }
 0x141   :  { %v3097_v49 = vadd.f32 %v5332_v26, %v3076_v46  ;;  %4776 = vmatmul.mubr.msk.f32.vlgmr.msra.gmra.mrb[54].mxu1 %vm3126_vm3, %v3109_v24  ;;  %v4189_v26 = vld [vmem:[%s5458_s6 + $0x18] sm:$0xff]  ;;  %v4389_v51 = vld [vmem:[%s5459_s7] ss:$0 sm:$0xff] }
 0x142   :  { %4784 = vmatpush3.msra.mxu1 %v3125_v48  ;;  %4785 = vmatprep.mubr.msk.f32.mxu1 %vm4864_vm0, %v4863_v0  ;;  %v4188_v0 = vld [vmem:[%s5458_s6 + $0x10] sm:$0xff] }
 0x143   :  { %v3111_v50 = vmax.f32 %v3097_v49, 0.0  ;;  %4801 = vmatpush3.bf16.msra.mxu0 %v4800_v52  ;;  %v4803_v54 = vpack.c.bf16 %v4189_v26, %v4188_v0 }
 0x144   :  { %4802 = vmatprep.subr.bf16.mxu0 %v4865_v53 }
 0x145   :  { %4786 = vmatmul.mubr.msk.f32.vlgmr.msra.gmra.mrb[56].mxu1 %vm3126_vm3, %v3111_v50 }
 0x147   :  { %4804 = vmatpush3.bf16.msra.mxu0 %v4803_v54 }
 0x1f9   :  { %v3196_v55 = vpop.f32.mrb[40].mxu0 }
 0x1fa   :  { %v4722_v56 = vpop.f32.mrb[41].mxu0  ;;  %v4150_v60 = vsel %vm4149_vm4, %v3196_v55, 0.0 }
 0x1fd   :  { %v3342_v57 = vpop.f32.mrb[42].mxu0 }
 0x1fe   :  { %v4732_v58 = vpop.f32.mrb[43].mxu0  ;;  %v4153_v4 = vsel %vm4149_vm4, %v3342_v57, 0.0 }
 0x200   :  { %v3269_v59 = vpop.f32.mrb[44].mxu1 }
 0x201   :  { %v4151_v61 = vsel %vm4149_vm4, %v3269_v59, 0.0  ;;  %v3488_v62 = vpop.f32.mrb[44].mxu0  ;;  %v4727_v63 = vpop.f32.mrb[45].mxu1 }
 0x202   :  { %v4152_v1 = vadd.f32 %v4151_v61, %v4150_v60  ;;  %v4742_v2 = vpop.f32.mrb[45].mxu0  ;;  %v4157_v13 = vsel %vm4149_vm4, %v3488_v62, 0.0 }
 0x204   :  { %v3415_v3 = vpop.f32.mrb[46].mxu1  ;;  %v4154_v5 = vadd.f32 %v4153_v4, %v4152_v1 }
 0x205   :  { %v4155_v7 = vsel %vm4149_vm4, %v3415_v3, 0.0  ;;  %v3634_v8 = vpop.f32.mrb[46].mxu0  ;;  %v4737_v10 = vpop.f32.mrb[47].mxu1 }
 0x206   :  { %v4156_v11 = vadd.f32 %v4155_v7, %v4154_v5  ;;  %v4752_v6 = vpop.f32.mrb[47].mxu0  ;;  %v4161_v23 = vsel %vm4149_vm4, %v3634_v8, 0.0 }
 0x208   :  { %v3561_v9 = vpop.f32.mrb[48].mxu1  ;;  %v4158_v14 = vadd.f32 %v4157_v13, %v4156_v11 }
 0x209   :  { %v4159_v16 = vsel %vm4149_vm4, %v3561_v9, 0.0  ;;  %v3780_v17 = vpop.f32.mrb[48].mxu0  ;;  %v4747_v19 = vpop.f32.mrb[49].mxu1 }
 0x20a   :  { %v4160_v20 = vadd.f32 %v4159_v16, %v4158_v14  ;;  %v4762_v22 = vpop.f32.mrb[49].mxu0  ;;  %v4165_v31 = vsel %vm4149_vm4, %v3780_v17, 0.0 }
 0x20c   :  { %v3707_v25 = vpop.f32.mrb[50].mxu1  ;;  %v4162_v27 = vadd.f32 %v4161_v23, %v4160_v20 }
 0x20d   :  { %v4163_v12 = vsel %vm4149_vm4, %v3707_v25, 0.0  ;;  %v3926_v28 = vpop.f32.mrb[50].mxu0  ;;  %v4757_v15 = vpop.f32.mrb[51].mxu1 }
 0x20e   :  { %v4164_v29 = vadd.f32 %v4163_v12, %v4162_v27  ;;  %v4772_v30 = vpop.f32.mrb[51].mxu0  ;;  %v4169_v39 = vsel %vm4149_vm4, %v3926_v28, 0.0 }
 0x210   :  { %v3853_v33 = vpop.f32.mrb[52].mxu1  ;;  %v4166_v34 = vadd.f32 %v4165_v31, %v4164_v29 }
 0x211   :  { %v4167_v35 = vsel %vm4149_vm4, %v3853_v33, 0.0  ;;  %v4072_v36 = vpop.f32.mrb[52].mxu0  ;;  %v4767_v37 = vpop.f32.mrb[53].mxu1 }
 0x212   :  { %v4168_v38 = vadd.f32 %v4167_v35, %v4166_v34  ;;  %v4782_v18 = vpop.f32.mrb[53].mxu0  ;;  %v4173_v44 = vsel %vm4149_vm4, %v4072_v36, 0.0 }
 0x214   :  { %v3999_v21 = vpop.f32.mrb[54].mxu1  ;;  %v4170_v40 = vadd.f32 %v4169_v39, %v4168_v38 }
 0x215   :  { %v4171_v41 = vsel %vm4149_vm4, %v3999_v21, 0.0  ;;  %v4777_v42 = vpop.f32.mrb[55].mxu1 }
 0x216   :  { %v4172_v43 = vadd.f32 %v4171_v41, %v4170_v40 }
 0x218   :  { %v4145_v45 = vpop.f32.mrb[56].mxu1  ;;  %v4174_v24 = vadd.f32 %v4173_v44, %v4172_v43 }
 0x219   :  { %v4175_v46 = vsel %vm4149_vm4, %v4145_v45, 0.0  ;;  %v4787_v48 = vpop.f32.mrb[57].mxu1 }
 0x21a   :  { %v4176_v49 = vadd.f32 %v4175_v46, %v4174_v24 }
 0x21c   :  { %v4184_v50 = vadd.f32 %v4388_v47, %v4176_v49 }
 0x21e   :  { %v4185_v32 = vmax.f32 %v4184_v50, 0.0 }
 0x220   :  { %4797 = vmatmul.mubr.msk.f32.vlgmr.msra.gmra.mrb[54].mxu0 %vm4197_vm5, %v4185_v32 }
 0x2f3   :  { %v4267_v52 = vpop.f32.mrb[54].mxu0 }
 0x2f4   :  { %v4268_v53 = vadd.f32 %v4389_v51, %v4267_v52  ;;  %v4798_v0 = vpop.f32.mrb[55].mxu0 }
 0x2f6   :  { %4271 = vst [vmem:[#allocation7] sm:$0x3] %v4268_v53 }
 0x2f7   :  { %4845 = shalt.err (!%p4842_p12)
}
 0x2f8   :  { %s4846_s21 = scalar_lea.hbm %s5460_s8, 32 }
 0x2f9   :  { %p4847_p13 = scmp.ne.s32.totalorder %s5460_s8, %s4846_s21  ;;  %p4850_p0 = scmp.lt.u32.totalorder %s4846_s21, %s5460_s8 }
 0x2fb   :  { %p4852_p1 = pnand %p4850_p0, %p4847_p13 }
 0x2fd   :  { %4855 = shalt.err (!%p4852_p1)
}
 0x2fe   :  { %4281 = dma.vmem_to_hbm [thread:$0]  %s4279_s19, 32, %s5460_s8, [#allocation6]  }
 0x2ff   :  { %4858 = dma.done.wait [#allocation6], 32  }
 0x300   :  { %4859 = vsyncadd [#allocation6], 4294967264 }
 0x301   :  { %4285 = vsyncpa [#allocation5], 1 }
 0x302   :  { %4286 = vsyncpa [#allocation6], 1 }

</bundles_post_ra>
